<compile_context>
chip_gen: v5e
topology: v5e:2x2
jax: 0.10.0
libtpu: 0.0.40
codegen_flags: <defaults>
</compile_context>

<pallas_src>
import math
import functools
import numpy as np
import jax
import jax.numpy as jnp
from jax import lax
from jax.experimental import pallas as pl
from jax.experimental.pallas import tpu as pltpu

# MXU operands cast to bf16 (f32 accumulate); VPU/EUP math stays f32.
_MXU_DTYPE = jnp.bfloat16


# --------------------------- VMEM / tile sizing ------------------------------

def _tpu_vmem_bytes():
    """Physical per-core VMEM; conservative 64 MiB (v7x) if query fails."""
    try:
        info = pltpu.get_tpu_info()
        for attr in ("vmem_capacity_bytes", "vmem_bytes", "vmem_size_bytes"):
            v = getattr(info, attr, None)
            if v:
                return int(v)
    except Exception:
        pass
    return 64 << 20


def _vmem_limit(need, cap):
    # Headroom over the measured working set, bounded by physical VMEM.
    return int(min(max(int(1.3 * need), 16 << 20), int(0.85 * cap)))


def _attn_working_set(TQ, N, H, O):
    streamed = (H * TQ * N * 2      # bias, bf16 (dominant stream)
                + N * 2 * O * 2     # K|V, bf16
                + TQ * O * 2        # Q, bf16
                + TQ * O * 4        # x_proj, f32
                + TQ * 4            # node mask
                + TQ * O * 4)       # output, f32
    weights = 2 * O * O * 2 + 2 * O * 4
    scratch = TQ * O * 4
    return 2 * (streamed + weights) + scratch   # x2: double-buffered pipeline


def _pick_attn_tile(N, H, O, cap):
    budget = int(0.55 * cap)
    for tq in (512, 256, 128, 64, 32, 16, 8):
        TQ = min(tq, N)
        need = _attn_working_set(TQ, N, H, O)
        if need <= budget:
            return TQ, need
    TQ = min(8, N)
    return TQ, _attn_working_set(TQ, N, H, O)


def _pick_proj_tile(M, K, O, cap):
    budget = int(0.55 * cap)
    for tm in (2048, 1024, 512, 256, 128):
        TM = min(tm, M)
        streamed = TM * K * 4 + TM * O * 2 + TM * 2 * O * 2 + TM * O * 4
        weights = K * 4 * O * 2 + 4 * O * 4
        need = 2 * (streamed + weights)
        if need <= budget:
            return TM, need
    TM = min(128, M)
    streamed = TM * K * 4 + TM * O * 2 + TM * 2 * O * 2 + TM * O * 4
    weights = K * 4 * O * 2 + 4 * O * 4
    return TM, 2 * (streamed + weights)


# ------------- fused Q / K|V / residual projection (tiled over rows) ---------

def _proj_kernel(x_ref, wq_ref, bq_ref, wkv_ref, bkv_ref, wr_ref, br_ref,
                 q_ref, kv_ref, xp_ref):
    x = x_ref[...].astype(_MXU_DTYPE)
    q = jnp.dot(x, wq_ref[...], preferred_element_type=jnp.float32) + bq_ref[...]
    q_ref[...] = q.astype(jnp.bfloat16)          # scale already folded into W_q
    kv = jnp.dot(x, wkv_ref[...], preferred_element_type=jnp.float32) + bkv_ref[...]
    kv_ref[...] = kv.astype(jnp.bfloat16)
    xp_ref[...] = jnp.dot(x, wr_ref[...],
                          preferred_element_type=jnp.float32) + br_ref[...]


def pallas_fused_projection(x2d, wq, bq, wkv, bkv, wr, br):
    M, K = x2d.shape
    O = wq.shape[1]
    cap = _tpu_vmem_bytes()
    TM, need = _pick_proj_tile(M, K, O, cap)
    return pl.pallas_call(
        _proj_kernel,
        out_shape=(jax.ShapeDtypeStruct((M, O), jnp.bfloat16),
                   jax.ShapeDtypeStruct((M, 2 * O), jnp.bfloat16),
                   jax.ShapeDtypeStruct((M, O), jnp.float32)),
        grid=(pl.cdiv(M, TM),),
        in_specs=[pl.BlockSpec((TM, K), lambda i: (i, 0)),
                  pl.BlockSpec((K, O), lambda i: (0, 0)),
                  pl.BlockSpec((1, O), lambda i: (0, 0)),
                  pl.BlockSpec((K, 2 * O), lambda i: (0, 0)),
                  pl.BlockSpec((1, 2 * O), lambda i: (0, 0)),
                  pl.BlockSpec((K, O), lambda i: (0, 0)),
                  pl.BlockSpec((1, O), lambda i: (0, 0))],
        out_specs=(pl.BlockSpec((TM, O), lambda i: (i, 0)),
                   pl.BlockSpec((TM, 2 * O), lambda i: (i, 0)),
                   pl.BlockSpec((TM, O), lambda i: (i, 0))),
        compiler_params=pltpu.CompilerParams(
            dimension_semantics=("parallel",),
            vmem_limit_bytes=_vmem_limit(need, cap)),
    )(x2d, wq, bq.reshape(1, O), wkv, bkv.reshape(1, 2 * O),
      wr, br.reshape(1, O))


# -------- fused attention + node mask + FFN + residual (per batch/q-tile) ----

def _attn_ffn_kernel(q_ref, kv_ref, bias_ref, xp_ref, mq_ref,
                     w1_ref, b1_ref, w2_ref, b2_ref, o_ref, h_scr,
                     *, num_heads, head_dim):
    H, Dh = num_heads, head_dim
    O = H * Dh
    q = q_ref[...]                         # (TQ, O) bf16, 1/sqrt(Dh) pre-folded
    kv = kv_ref[...]                       # (N , 2O) bf16 = [K | V]

    for h in range(H):                     # per-head 2D MXU matmuls
        qh = q[:, h * Dh:(h + 1) * Dh]
        kh = kv[:, h * Dh:(h + 1) * Dh]
        vh = kv[:, O + h * Dh:O + (h + 1) * Dh]
        s = lax.dot_general(qh, kh, (((1,), (1,)), ((), ())),
                            preferred_element_type=jnp.float32)
        # bias already carries: edge scatter + self-loop diag + key-side -1e6.
        s = s + bias_ref[h]
        s = s - jnp.max(s, axis=-1, keepdims=True)
        p = jnp.exp(s)
        denom = jnp.sum(p, axis=-1, keepdims=True)
        o_h = jnp.dot(p.astype(_MXU_DTYPE), vh,
                      preferred_element_type=jnp.float32)
        # Deferred softmax normalization on the small (TQ, Dh) result.
        h_scr[:, h * Dh:(h + 1) * Dh] = o_h * pl.reciprocal(denom, approx=True)

    mq = mq_ref[...]                       # (TQ, 1) node mask
    h_att = h_scr[...] * mq                # mask before FFN
    z = jnp.dot(h_att.astype(_MXU_DTYPE), w1_ref[...],
                preferred_element_type=jnp.float32) + b1_ref[...]
    z = jnp.maximum(z, 0.0)
    h2 = jnp.dot(z.astype(_MXU_DTYPE), w2_ref[...],
                 preferred_element_type=jnp.float32) + b2_ref[...]
    o_ref[...] = (h2 * mq) * 0.5 + xp_ref[...] * 0.5   # mask after FFN + residual


def pallas_attention_ffn(q, kv, bias, xproj, mask_q,
                         w_f1, b_f1, w_f2, b_f2, *, num_heads, head_dim):
    B, N, O = q.shape
    H = num_heads
    cap = _tpu_vmem_bytes()
    TQ, need = _pick_attn_tile(N, H, O, cap)
    NQ = pl.cdiv(N, TQ)                    # ragged last q-tile allowed
    kern = functools.partial(_attn_ffn_kernel, num_heads=H, head_dim=head_dim)
    return pl.pallas_call(
        kern,
        out_shape=jax.ShapeDtypeStruct((B, N, O), jnp.float32),
        grid=(B, NQ),
        in_specs=[pl.BlockSpec((None, TQ, O), lambda b, qi: (b, qi, 0)),
                  pl.BlockSpec((None, N, 2 * O), lambda b, qi: (b, 0, 0)),
                  pl.BlockSpec((None, H, TQ, N), lambda b, qi: (b, 0, qi, 0)),
                  pl.BlockSpec((None, TQ, O), lambda b, qi: (b, qi, 0)),
                  pl.BlockSpec((None, TQ, 1), lambda b, qi: (b, qi, 0)),
                  pl.BlockSpec((O, O), lambda b, qi: (0, 0)),
                  pl.BlockSpec((1, O), lambda b, qi: (0, 0)),
                  pl.BlockSpec((O, O), lambda b, qi: (0, 0)),
                  pl.BlockSpec((1, O), lambda b, qi: (0, 0))],
        out_specs=pl.BlockSpec((None, TQ, O), lambda b, qi: (b, qi, 0)),
        scratch_shapes=[pltpu.VMEM((TQ, O), jnp.float32)],
        compiler_params=pltpu.CompilerParams(
            dimension_semantics=("parallel", "parallel"),
            vmem_limit_bytes=_vmem_limit(need, cap)),
    )(q, kv, bias, xproj, mask_q,
      w_f1, b_f1.reshape(1, O), w_f2, b_f2.reshape(1, O))


# --------------------------- Parameters / forward ----------------------------

def init_params(key, input_dim, output_dim, num_heads, edge_attr_dim):
    head_dim = output_dim // num_heads
    ks = jax.random.split(key, 8)

    def lin(k, fan_in, fan_out):
        bound = 1.0 / math.sqrt(fan_in)
        kw, kb = jax.random.split(k)
        w = jax.random.uniform(kw, (fan_in, fan_out), jnp.float32, -bound, bound)
        b = jax.random.uniform(kb, (fan_out,), jnp.float32, -bound, bound)
        return w, b

    p = {}
    p['w_qkv'], p['b_qkv'] = lin(ks[0], input_dim, 3 * output_dim)
    p['w_e1'], p['b_e1'] = lin(ks[1], edge_attr_dim, edge_attr_dim)
    p['w_e2'], p['b_e2'] = lin(ks[2], edge_attr_dim, edge_attr_dim)
    p['w_f1'], p['b_f1'] = lin(ks[3], output_dim, output_dim)
    p['w_f2'], p['b_f2'] = lin(ks[4], output_dim, output_dim)
    p['w_res'], p['b_res'] = lin(ks[5], input_dim, output_dim)
    p['self_loop_w'] = (1.0 / head_dim
                        + jax.random.uniform(ks[6], (num_heads,), jnp.float32))
    # shifts/widths exist in the torch module but their contribution
    # (log(moire_adj)) is overwritten in the original forward -> no output effect.
    p['shifts'] = 1.0 + jax.random.uniform(ks[7], (num_heads,), jnp.float32)
    p['widths'] = 1.3 ** p['shifts']
    return p


def moire_layer_forward(p, x, adj, edge_index, edge_attr, mask, num_heads):
    del adj  # only feeds the moire_adj term, dead code in the reference forward
    B, N, Din = x.shape
    O = p['w_res'].shape[1]
    H = num_heads
    Dh = O // H
    scale = 1.0 / math.sqrt(Dh)

    # Fold 1/sqrt(Dh) into W_q / b_q; cast MXU weights to bf16 once.
    w_q = (p['w_qkv'][:, :O] * scale).astype(_MXU_DTYPE)
    b_q = p['b_qkv'][:O] * scale
    w_kv = p['w_qkv'][:, O:].astype(_MXU_DTYPE)
    b_kv = p['b_qkv'][O:]
    w_res = p['w_res'].astype(_MXU_DTYPE)

    q, kv, xproj = pallas_fused_projection(
        x.reshape(B * N, Din), w_q, b_q, w_kv, b_kv, w_res, p['b_res'])
    q = q.reshape(B, N, O)
    kv = kv.reshape(B, N, 2 * O)
    xproj = xproj.reshape(B, N, O)

    # Edge FFN applied twice (eval mode). Tiny lane-sparse matmuls
    # (edge_attr_dim == num_heads) -> plain XLA, fused with the scatter below.
    e = edge_attr
    for _ in range(2):
        hh = jnp.maximum(e @ p['w_e1'] + p['b_e1'], 0.0)
        e = hh @ p['w_e2'] + p['b_e2']

    # Dense additive score bias in bf16 with self-loop diagonal and key-side
    # mask folded in (edges assumed unique, matching torch's indexed +=).
    # TODO(synk): eliminate the dense (B,H,N,N) bias entirely with an in-kernel
    # scatter via PrefetchScalarGridSpec (per-q-tile bucketed edge lists).
    mask_f = mask.astype(jnp.float32)
    bias = jnp.zeros((B, H, N, N), jnp.float32)
    bidx = jnp.arange(B)[:, None]
    bias = bias.at[bidx, :, edge_index[:, 0, :], edge_index[:, 1, :]].add(e)
    bias = bias + (jnp.eye(N, dtype=jnp.float32)[None, None]
                   * p['self_loop_w'].reshape(1, H, 1, 1))
    bias = bias + jnp.where(mask_f > 0.5, 0.0, -1e6)[:, None, None, :]
    bias = bias.astype(jnp.bfloat16)

    out = pallas_attention_ffn(
        q, kv, bias, xproj, mask_f.reshape(B, N, 1),
        p['w_f1'].astype(_MXU_DTYPE), p['b_f1'],
        p['w_f2'].astype(_MXU_DTYPE), p['b_f2'],
        num_heads=H, head_dim=Dh)
    return out


# --------------------------- Pure-JAX reference ------------------------------

def reference_forward(p, x, adj, edge_index, edge_attr, mask, num_heads):
    del adj
    B, N, Din = x.shape
    O = p['w_res'].shape[1]
    H = num_heads
    Dh = O // H
    qkv = x @ p['w_qkv'] + p['b_qkv']
    qkv = qkv.reshape(B, N, 3, H, Dh).transpose(2, 0, 3, 1, 4)
    Q, K, V = qkv[0], qkv[1], qkv[2]
    e = edge_attr
    for _ in range(2):
        e = jnp.maximum(e @ p['w_e1'] + p['b_e1'], 0.0) @ p['w_e2'] + p['b_e2']
    scores = jnp.einsum('bhqd,bhkd->bhqk', Q, K) / math.sqrt(Dh)
    bidx = jnp.arange(B)[:, None]
    scores = scores.at[bidx, :, edge_index[:, 0, :], edge_index[:, 1, :]].add(e)
    eye = jnp.eye(N, dtype=jnp.float32)
    adj_scores = scores + eye[None, None] * p['self_loop_w'].reshape(1, H, 1, 1)
    m2 = (mask[:, :, None] & mask[:, None, :])[:, None]
    adj_scores = jnp.where(m2, adj_scores, -1e6)
    aw = jax.nn.softmax(adj_scores, axis=-1)
    h = jnp.einsum('bhqk,bhkd->bhqd', aw, V).transpose(0, 2, 1, 3).reshape(B, N, O)
    h = h * mask[..., None]
    h = jnp.maximum(h @ p['w_f1'] + p['b_f1'], 0.0) @ p['w_f2'] + p['b_f2']
    h = h * mask[..., None]
    x_proj = x @ p['w_res'] + p['b_res']
    return h * 0.5 + x_proj * 0.5


# --------------------------------- Main ---------------------------------------

if __name__ == "__main__":
    B, N, Din, O, H, E = 2, 16, 16, 32, 4, 20
    Da = H  # edge_attr_dim must equal num_heads for the original's `+=` broadcast

    key = jax.random.PRNGKey(0)
    kp, kx, ke, kidx, km = jax.random.split(key, 5)
    params = init_params(kp, Din, O, H, Da)

    x = jax.random.normal(kx, (B, N, Din), jnp.float32)
    edge_attr = jax.random.normal(ke, (B, E, Da), jnp.float32)

    # Unique edges per batch element.
    perm = jax.vmap(lambda k: jax.random.permutation(k, N * N)[:E])(
        jax.random.split(kidx, B))
    edge_index = jnp.stack([perm // N, perm % N], axis=1).astype(jnp.int32)  # (B,2,E)
    adj = jnp.zeros((B, N, N), jnp.float32).at[
        jnp.arange(B)[:, None], edge_index[:, 0], edge_index[:, 1]].set(1.0)
    mask = jnp.ones((B, N), dtype=bool).at[1, N - 3:].set(False)

    out = moire_layer_forward(params, x, adj, edge_index, edge_attr, mask, H)
    out = jax.block_until_ready(out)

    ref = reference_forward(params, x, adj, edge_index, edge_attr, mask, H)
    # bf16 Q/K/V + bf16 bias + approx reciprocal (f32 accumulation throughout).
    np.testing.assert_allclose(np.asarray(out), np.asarray(ref),
                               rtol=4e-2, atol=4e-2)
    print("KERNEL_OK")
</pallas_src>

<mosaic_0001>
module attributes {stable_mosaic.version = 11 : i64} {
  func.func @_proj_kernel(%arg0: i32, %arg1: memref<32x16xf32, #tpu.memory_space<vmem>>, %arg2: memref<16x32xbf16, #tpu.memory_space<vmem>>, %arg3: memref<1x32xf32, #tpu.memory_space<vmem>>, %arg4: memref<16x64xbf16, #tpu.memory_space<vmem>>, %arg5: memref<1x64xf32, #tpu.memory_space<vmem>>, %arg6: memref<16x32xbf16, #tpu.memory_space<vmem>>, %arg7: memref<1x32xf32, #tpu.memory_space<vmem>>, %arg8: memref<32x32xbf16, #tpu.memory_space<vmem>>, %arg9: memref<32x64xbf16, #tpu.memory_space<vmem>>, %arg10: memref<32x32xf32, #tpu.memory_space<vmem>>) attributes {dimension_semantics = [#tpu.dimension_semantics<parallel>], iteration_bounds = array<i64: 1>, scalar_prefetch = 0 : i64, scratch_operands = 0 : i64, tpu.core_type = #tpu.core_type<tc>, window_params = [{transform_indices = @transform_0, window_bounds = array<i64: 32, 16>}, {pipeline_mode = #tpu.pipeline_mode<synchronous>, transform_indices = @transform_1, window_bounds = array<i64: 16, 32>}, {pipeline_mode = #tpu.pipeline_mode<synchronous>, transform_indices = @transform_2, window_bounds = array<i64: 1, 32>}, {pipeline_mode = #tpu.pipeline_mode<synchronous>, transform_indices = @transform_3, window_bounds = array<i64: 16, 64>}, {pipeline_mode = #tpu.pipeline_mode<synchronous>, transform_indices = @transform_4, window_bounds = array<i64: 1, 64>}, {pipeline_mode = #tpu.pipeline_mode<synchronous>, transform_indices = @transform_5, window_bounds = array<i64: 16, 32>}, {pipeline_mode = #tpu.pipeline_mode<synchronous>, transform_indices = @transform_6, window_bounds = array<i64: 1, 32>}, {transform_indices = @transform_7, window_bounds = array<i64: 32, 32>}, {transform_indices = @transform_8, window_bounds = array<i64: 32, 64>}, {transform_indices = @transform_9, window_bounds = array<i64: 32, 32>}]} {
    %c0 = arith.constant 0 : index
    %c0_0 = arith.constant 0 : index
    %0 = vector.load %arg1[%c0, %c0_0] : memref<32x16xf32, #tpu.memory_space<vmem>>, vector<32x16xf32>
    %1 = arith.truncf %0 : vector<32x16xf32> to vector<32x16xbf16>
    %c0_1 = arith.constant 0 : index
    %c0_2 = arith.constant 0 : index
    %2 = vector.load %arg2[%c0_1, %c0_2] : memref<16x32xbf16, #tpu.memory_space<vmem>>, vector<16x32xbf16>
    %cst = arith.constant dense<0.000000e+00> : vector<32x32xf32>
    %3 = tpu.matmul %1, %2, %cst {dimension_numbers = #tpu.dot_dimension_numbers<[1], [0], [0], [1], [0, 0, 1, 1], [], []>} : vector<32x16xbf16>, vector<16x32xbf16>, vector<32x32xf32> -> vector<32x32xf32>
    %c0_3 = arith.constant 0 : index
    %c0_4 = arith.constant 0 : index
    %4 = vector.load %arg3[%c0_3, %c0_4] : memref<1x32xf32, #tpu.memory_space<vmem>>, vector<1x32xf32>
    %5 = vector.broadcast %4 : vector<1x32xf32> to vector<32x32xf32>
    %6 = arith.addf %3, %5 : vector<32x32xf32>
    %7 = arith.truncf %6 : vector<32x32xf32> to vector<32x32xbf16>
    %c0_5 = arith.constant 0 : index
    %c0_6 = arith.constant 0 : index
    %8 = vector.load %arg8[%c0_5, %c0_6] : memref<32x32xbf16, #tpu.memory_space<vmem>>, vector<32x32xbf16>
    tpu.vector_store %arg8[%c0_5, %c0_6], %7 {strides = array<i32>} : memref<32x32xbf16, #tpu.memory_space<vmem>>, vector<32x32xbf16>,
    %c0_7 = arith.constant 0 : index
    %c0_8 = arith.constant 0 : index
    %9 = vector.load %arg4[%c0_7, %c0_8] : memref<16x64xbf16, #tpu.memory_space<vmem>>, vector<16x64xbf16>
    %cst_9 = arith.constant dense<0.000000e+00> : vector<32x64xf32>
    %10 = tpu.matmul %1, %9, %cst_9 {dimension_numbers = #tpu.dot_dimension_numbers<[1], [0], [0], [1], [0, 0, 1, 1], [], []>} : vector<32x16xbf16>, vector<16x64xbf16>, vector<32x64xf32> -> vector<32x64xf32>
    %c0_10 = arith.constant 0 : index
    %c0_11 = arith.constant 0 : index
    %11 = vector.load %arg5[%c0_10, %c0_11] : memref<1x64xf32, #tpu.memory_space<vmem>>, vector<1x64xf32>
    %12 = vector.broadcast %11 : vector<1x64xf32> to vector<32x64xf32>
    %13 = arith.addf %10, %12 : vector<32x64xf32>
    %14 = arith.truncf %13 : vector<32x64xf32> to vector<32x64xbf16>
    %c0_12 = arith.constant 0 : index
    %c0_13 = arith.constant 0 : index
    %15 = vector.load %arg9[%c0_12, %c0_13] : memref<32x64xbf16, #tpu.memory_space<vmem>>, vector<32x64xbf16>
    tpu.vector_store %arg9[%c0_12, %c0_13], %14 {strides = array<i32>} : memref<32x64xbf16, #tpu.memory_space<vmem>>, vector<32x64xbf16>,
    %c0_14 = arith.constant 0 : index
    %c0_15 = arith.constant 0 : index
    %16 = vector.load %arg6[%c0_14, %c0_15] : memref<16x32xbf16, #tpu.memory_space<vmem>>, vector<16x32xbf16>
    %cst_16 = arith.constant dense<0.000000e+00> : vector<32x32xf32>
    %17 = tpu.matmul %1, %16, %cst_16 {dimension_numbers = #tpu.dot_dimension_numbers<[1], [0], [0], [1], [0, 0, 1, 1], [], []>} : vector<32x16xbf16>, vector<16x32xbf16>, vector<32x32xf32> -> vector<32x32xf32>
    %c0_17 = arith.constant 0 : index
    %c0_18 = arith.constant 0 : index
    %18 = vector.load %arg7[%c0_17, %c0_18] : memref<1x32xf32, #tpu.memory_space<vmem>>, vector<1x32xf32>
    %19 = vector.broadcast %18 : vector<1x32xf32> to vector<32x32xf32>
    %20 = arith.addf %17, %19 : vector<32x32xf32>
    %c0_19 = arith.constant 0 : index
    %c0_20 = arith.constant 0 : index
    %21 = vector.load %arg10[%c0_19, %c0_20] : memref<32x32xf32, #tpu.memory_space<vmem>>, vector<32x32xf32>
    tpu.vector_store %arg10[%c0_19, %c0_20], %20 {strides = array<i32>} : memref<32x32xf32, #tpu.memory_space<vmem>>, vector<32x32xf32>,
    return
  }
  func.func @transform_0(%arg0: i32) -> (i32, i32) {
    %c0_i32 = arith.constant 0 : i32
    %c0_i32_0 = arith.constant 0 : i32
    return %arg0, %c0_i32 : i32, i32
  }
  func.func @transform_1(%arg0: i32) -> (i32, i32) {
    %c0_i32 = arith.constant 0 : i32
    %c0_i32_0 = arith.constant 0 : i32
    %c0_i32_1 = arith.constant 0 : i32
    return %c0_i32, %c0_i32_0 : i32, i32
  }
  func.func @transform_2(%arg0: i32) -> (i32, i32) {
    %c0_i32 = arith.constant 0 : i32
    %c0_i32_0 = arith.constant 0 : i32
    %c0_i32_1 = arith.constant 0 : i32
    return %c0_i32, %c0_i32_0 : i32, i32
  }
  func.func @transform_3(%arg0: i32) -> (i32, i32) {
    %c0_i32 = arith.constant 0 : i32
    %c0_i32_0 = arith.constant 0 : i32
    %c0_i32_1 = arith.constant 0 : i32
    return %c0_i32, %c0_i32_0 : i32, i32
  }
  func.func @transform_4(%arg0: i32) -> (i32, i32) {
    %c0_i32 = arith.constant 0 : i32
    %c0_i32_0 = arith.constant 0 : i32
    %c0_i32_1 = arith.constant 0 : i32
    return %c0_i32, %c0_i32_0 : i32, i32
  }
  func.func @transform_5(%arg0: i32) -> (i32, i32) {
    %c0_i32 = arith.constant 0 : i32
    %c0_i32_0 = arith.constant 0 : i32
    %c0_i32_1 = arith.constant 0 : i32
    return %c0_i32, %c0_i32_0 : i32, i32
  }
  func.func @transform_6(%arg0: i32) -> (i32, i32) {
    %c0_i32 = arith.constant 0 : i32
    %c0_i32_0 = arith.constant 0 : i32
    %c0_i32_1 = arith.constant 0 : i32
    return %c0_i32, %c0_i32_0 : i32, i32
  }
  func.func @transform_7(%arg0: i32) -> (i32, i32) {
    %c0_i32 = arith.constant 0 : i32
    %c0_i32_0 = arith.constant 0 : i32
    return %arg0, %c0_i32 : i32, i32
  }
  func.func @transform_8(%arg0: i32) -> (i32, i32) {
    %c0_i32 = arith.constant 0 : i32
    %c0_i32_0 = arith.constant 0 : i32
    return %arg0, %c0_i32 : i32, i32
  }
  func.func @transform_9(%arg0: i32) -> (i32, i32) {
    %c0_i32 = arith.constant 0 : i32
    %c0_i32_0 = arith.constant 0 : i32
    return %arg0, %c0_i32 : i32, i32
  }
}

</mosaic_0001>

<bundles_post_ra>
// kernel: tpu_custom_call.1
= control target key start
LH: loop header
LB: loop body
LE: loop exit
PB: predicated region body
PF: predicated region fallthrough
CT: control target
= control target key end

     0   :  { %15 = vsyncpa [#allocation3], 0  ;;  %vm50_vm0 = vcmask 130048   ;;  %s430_s0 = inlined_call_operand.vmem [shape: f32[32,16], index: 0, kind: input, shape index: {}]   ;;  %s431_s1 = inlined_call_operand.vmem [shape: bf16[16,32], index: 1, kind: input, shape index: {}]   ;;  %s432_s2 = inlined_call_operand.vmem [shape: f32[1,32], index: 2, kind: input, shape index: {}]   ;;  %s433_s3 = inlined_call_operand.vmem [shape: bf16[16,64], index: 3, kind: input, shape index: {}]   ;;  %s434_s4 = inlined_call_operand.vmem [shape: f32[1,64], index: 4, kind: input, shape index: {}]   ;;  %s435_s5 = inlined_call_operand.vmem [shape: bf16[16,32], index: 5, kind: input, shape index: {}]   ;;  %s436_s6 = inlined_call_operand.vmem [shape: f32[1,32], index: 6, kind: input, shape index: {}]   ;;  %s437_s7 = inlined_call_operand.hbm [shape: bf16[32,32], index: 7, kind: output, shape index: {0}]   ;;  %s438_s8 = inlined_call_operand.hbm [shape: bf16[32,64], index: 8, kind: output, shape index: {1}]   ;;  %s439_s9 = inlined_call_operand.hbm [shape: f32[32,32], index: 9, kind: output, shape index: {2}]  }
   0x1   :  { %v233_v0 = vld [vmem:[%s433_s3] sm:$0xff]  ;;  %v33_v3 = vld [vmem:[%s430_s0 + $0x8] sm:$0xff]  ;;  %v34_v5 = vld [vmem:[%s430_s0 + $0x10] sm:$0xff] }
   0x2   :  { %v234_v1 = vld [vmem:[%s435_s5] sm:$0xff]  ;;  %104 = vmatpush.bf16.msra.mxu1 %v233_v0  ;;  %v35_v7 = vld [vmem:[%s430_s0 + $0x18] sm:$0xff] }
   0x3   :  { %v32_v2 = vld [vmem:[%s430_s0] sm:$0xff]  ;;  %144 = vmatpush.bf16.msra.mxu2 %v234_v1  ;;  %v37_v8 = vpack.c.bf16 %v35_v7, %v34_v5 }
   0x4   :  { %v232_v4 = vld [vmem:[%s431_s1] sm:$0xff]  ;;  %v36_v6 = vpack.c.bf16 %v33_v3, %v32_v2 }
   0x5   :  { %235 = vmatpush.bf16.msra.mxu3 %v232_v4  ;;  %64 = vmatpush.bf16.msra.mxu0 %v232_v4 }
   0x6   :  { %16 = vsyncpa [#allocation5], 0  ;;  %224 = vmatmul.msk.bf16.vlgmr.msra.gmra.mxu1 %vm50_vm0, %v36_v6  ;;  %230 = vmatmul.msk.bf16.vlgmr.msra.gmra.mxu2 %vm50_vm0, %v36_v6  ;;  %v243_v9 = vld [vmem:[%s434_s4] ss:$0 sm:$0xff]  ;;  %vm120_vm1 = vcmask 519168   ;;  %vm80_vm2 = vcmask 257024  }
   0x7   :  { %v245_v10 = vld [vmem:[%s432_s2] ss:$0 sm:$0xff]  ;;  %vm156_vm3 = vcmask 261120   ;;  %s322_s2 = smov [#allocation2]   ;;  %s167_s26 = sshll.u32 %s437_s7, 4  ;;  %s168_s26 = int_to_ptr.hbm [resolvable:$true] %s167_s26 }
   0x8   :  { %219 = vmatmul.msk.bf16.vlgmr.msra.gmra.mxu3 %vm50_vm0, %v37_v8  ;;  %218 = vmatmul.msk.bf16.vlgmr.msra.gmra.mxu0 %vm50_vm0, %v36_v6  ;;  %v244_v16 = vld [vmem:[%s436_s6] ss:$0 sm:$0xff]  ;;  %s165_s4 = sshll.u32 %s322_s2, 4  ;;  %s323_s27 = smov 64   ;;  %s166_s4 = int_to_ptr.vmem [resolvable:$true] %s165_s4 }
   0x9   :  { %s324_s28 = smov 4   ;;  %s325_s7 = smov [#allocation4]  }
   0xa   :  { %s178_s29 = sshll.u32 %s325_s7, 4  ;;  %s180_s11 = sshll.u32 %s438_s8, 4  ;;  %s179_s29 = int_to_ptr.vmem [resolvable:$true] %s178_s29  ;;  %s181_s11 = int_to_ptr.hbm [resolvable:$true] %s180_s11 }
   0xb   :  { %s326_s12 = smov [#allocation6]   ;;  %s193_s16 = sshll.u32 %s439_s9, 4  ;;  %s194_s16 = int_to_ptr.hbm [resolvable:$true] %s193_s16 }
   0xc   :  { %s191_s13 = sshll.u32 %s326_s12, 4  ;;  %s327_s8 = smov 128   ;;  %s192_s13 = int_to_ptr.vmem [resolvable:$true] %s191_s13 }
   0xd   :  { %s328_s17 = smov 8  }
  0x16   :  { %225 = vmatmul.msk.bf16.gmra.mxu1 %vm50_vm0, %v37_v8  ;;  %231 = vmatmul.msk.bf16.gmra.mxu2 %vm50_vm0, %v37_v8 }
  0x83   :  { %v106_v11 = vpop.f32.mrf.mxu1 }
  0x84   :  { %v107_v12 = vadd.f32 %v243_v9, %v106_v11 }
  0x85   :  { %v66_v13 = vpop.f32.mrf.mxu0 }
  0x86   :  { %v67_v14 = vadd.f32 %v245_v10, %v66_v13  ;;  %v116_v15 = vpack.c.bf16 %v107_v12, %v107_v12 }
  0x88   :  { %v76_v17 = vpack.c.bf16 %v67_v14, %v67_v14  ;;  %121 = vst.msk [vmem:[#allocation4] sm:$0xf] %vm120_vm1, %v116_v15 }
  0x89   :  { %v146_v18 = vpop.f32.mrf.mxu2 }
  0x8a   :  { %81 = vst.msk [vmem:[#allocation2] sm:$0xf] %vm80_vm2, %v76_v17  ;;  %v147_v19 = vadd.f32 %v244_v16, %v146_v18 }
  0x8b   :  { %v71_v20 = vpop.f32.mrf.mxu3  ;;  %v108_v21 = vpop.f32.mrf.mxu1 }
  0x8c   :  { %v72_v22 = vadd.f32 %v245_v10, %v71_v20  ;;  %157 = vst.msk [vmem:[#allocation6] sm:$0xff] %vm156_vm3, %v147_v19  ;;  %v109_v23 = vadd.f32 %v243_v9, %v108_v21 }
  0x8d   :  { %v68_v24 = vpop.f32.mrf.mxu0 }
  0x8e   :  { %v78_v25 = vpack.c.bf16 %v72_v22, %v72_v22  ;;  %v69_v26 = vadd.f32 %v245_v10, %v68_v24  ;;  %v117_v27 = vpack.c.bf16 %v109_v23, %v109_v23 }
  0x90   :  { %83 = vst.msk [vmem:[#allocation2 + $0x8] sm:$0xf] %vm80_vm2, %v78_v25  ;;  %v77_v28 = vpack.c.bf16 %v69_v26, %v69_v26 }
  0x91   :  { %122 = vst.msk [vmem:[#allocation4 + $0x4] sm:$0xf] %vm120_vm1, %v117_v27  ;;  %v148_v29 = vpop.f32.mrf.mxu2 }
  0x92   :  { %82 = vst.msk [vmem:[#allocation2 + $0x4] sm:$0xf] %vm80_vm2, %v77_v28  ;;  %v149_v30 = vadd.f32 %v244_v16, %v148_v29 }
  0x93   :  { %v73_v31 = vpop.f32.mrf.mxu3  ;;  %v111_v32 = vpop.f32.mrf.mxu1 }
  0x94   :  { %v74_v33 = vadd.f32 %v245_v10, %v73_v31  ;;  %158 = vst.msk [vmem:[#allocation6 + $0x8] sm:$0xff] %vm156_vm3, %v149_v30  ;;  %v112_v34 = vadd.f32 %v243_v9, %v111_v32 }
  0x96   :  { %v79_v35 = vpack.c.bf16 %v74_v33, %v74_v33  ;;  %v118_v36 = vpack.c.bf16 %v112_v34, %v112_v34 }
  0x98   :  { %84 = vst.msk [vmem:[#allocation2 + $0xc] sm:$0xf] %vm80_vm2, %v79_v35 }
  0x99   :  { %123 = vst.msk [vmem:[#allocation4 + $0x8] sm:$0xf] %vm120_vm1, %v118_v36  ;;  %173 = dma.vmem_to_hbm [thread:$0]  %s166_s4, 256, %s168_s26, [#allocation3], %s323_s27, %s323_s27, %s324_s28   ;;  %v151_v37 = vpop.f32.mrf.mxu2 }
  0x9a   :  { %v152_v38 = vadd.f32 %v244_v16, %v151_v37 }
  0x9b   :  { %v113_v39 = vpop.f32.mrf.mxu1 }
  0x9c   :  { %159 = vst.msk [vmem:[#allocation6 + $0x10] sm:$0xff] %vm156_vm3, %v152_v38  ;;  %v114_v40 = vadd.f32 %v243_v9, %v113_v39 }
  0x9e   :  { %v119_v41 = vpack.c.bf16 %v114_v40, %v114_v40 }
  0xa0   :  { %124 = vst.msk [vmem:[#allocation4 + $0xc] sm:$0xf] %vm120_vm1, %v119_v41 }
  0xa1   :  { %v153_v42 = vpop.f32.mrf.mxu2  ;;  %186 = dma.vmem_to_hbm [thread:$0]  %s179_s29, 256, %s181_s11, [#allocation5], %s323_s27, %s323_s27, %s324_s28  }
  0xa2   :  { %v154_v43 = vadd.f32 %v244_v16, %v153_v42 }
  0xa4   :  { %160 = vst.msk [vmem:[#allocation6 + $0x18] sm:$0xff] %vm156_vm3, %v154_v43 }
  0xa5   :  { %199 = dma.vmem_to_hbm [thread:$0]  %s192_s13, 512, %s194_s16, [#allocation5], %s327_s8, %s327_s8, %s328_s17  }
  0xa6   :  { %318 = dma.done.wait [#allocation3], 256  }
  0xa7   :  { %319 = vsyncadd [#allocation3], 4294967040 }
  0xa8   :  { %320 = dma.done.wait [#allocation5], 768  }
  0xa9   :  { %321 = vsyncadd [#allocation5], 4294966528 }
  0xaa   :  { %212 = vsyncpa [#allocation3], 1 }
  0xab   :  { %213 = vsyncpa [#allocation5], 1 }

</bundles_post_ra>
